<compile_context>
chip_gen: v7x
topology: tpu7x:2x2x1
jax: 0.10.0
libtpu: 0.0.40
codegen_flags: <defaults>
</compile_context>

<pallas_src>
import math
from functools import partial

import jax
import jax.numpy as jnp
from jax.experimental import pallas as pl
from jax.experimental.pallas import tpu as pltpu

# Tight f32 matmuls in the pure-JAX reference so the numerical check is strict.
jax.config.update("jax_default_matmul_precision", "float32")


# ----------------------------------------------------------------------------
# Pallas kernels
# ----------------------------------------------------------------------------
def _cl_pos_kernel(x_ref, p_ref, ab_ref, out_ref, *, p2, d):
    """content_rel_attn=False: out[h] = concat(content[h], pos @ R_h).

    The per-head block-diagonal rotation is applied head-vectorized as two
    VPU FMAs; the output is produced by two slab stores.
    """
    x = x_ref[...]                                   # (h, tn, d)
    pcat = p_ref[...]                                # (tn, 2*p2) = [pos | pos pair-swapped]
    pos = pcat[:, :p2]
    pos_sw = pcat[:, p2:]
    ab = ab_ref[...]                                 # (h, 2, p2)
    # pb[h] = pos * alpha_interleaved[h] + pos_swapped * signed_beta[h]
    pb = pos[None] * ab[:, 0:1, :] + pos_sw[None] * ab[:, 1:2, :]   # (h, tn, p2)
    out_ref[:, :, :d] = x
    out_ref[:, :, d:] = pb.astype(out_ref.dtype)


def _cl_rel_kernel(x_ref, p_ref, ab_ref, wc_ref, bc_ref, out_ref, *, heads, p2, d):
    """content_rel_attn=True: out[h] = concat(content[h], c_rel[h], pos @ R_h).

    The conditional projection pp = x_flat @ Wc + bc is accumulated over
    per-head K=d blocks (the content tile is already resident in VMEM; no
    relayout of x is required) with f32 accumulation; the conditional
    rotation is the same two-FMA pattern as the fixed one.
    """
    x = x_ref[...]                                   # (h, tn, d)
    pcat = p_ref[...]                                # (tn, 2*p2)
    pos = pcat[:, :p2]
    pos_sw = pcat[:, p2:]
    ab = ab_ref[...]                                 # (h, 2, p2)
    wc = wc_ref[...]                                 # (h, d, h*q)
    q = 2 * p2

    # Fixed positional rotation, head-vectorized.
    pb = pos[None] * ab[:, 0:1, :] + pos_sw[None] * ab[:, 1:2, :]   # (h, tn, p2)

    # Conditional projection (single wide output, f32 accumulation).
    pp = bc_ref[...].astype(jnp.float32)                            # (1, h*q)
    for hh in range(heads):
        pp = pp + jnp.dot(x[hh], wc[hh], preferred_element_type=jnp.float32)
    pp = pp.astype(x.dtype)                                         # (tn, h*q)

    out_ref[:, :, :d] = x                                           # slab store
    out_ref[:, :, d + p2:] = pb.astype(out_ref.dtype)               # slab store
    # Conditional rotation: only the tiny p2-wide pieces remain per-head.
    for hh in range(heads):
        a_c = pp[:, hh * q: hh * q + p2]            # alpha_c, interleaved per pair
        b_c = pp[:, hh * q + p2: (hh + 1) * q]      # (-beta_c, +beta_c) per pair
        out_ref[hh, :, d:d + p2] = (pos * a_c + pos_sw * b_c).astype(out_ref.dtype)


# ----------------------------------------------------------------------------
# Module wrapper
# ----------------------------------------------------------------------------
class ConstrainedLinearPallas:
    def __init__(self, in_features, out_features, pos_scales, heads,
                 content_rel_attn=False, bias=True, key=None):
        self.in_features = in_features
        self.out_features = out_features      # unused in forward (matches PyTorch)
        self.pos_scales = pos_scales
        self.heads = heads
        self.content_rel_attn = content_rel_attn
        # The PyTorch module's `offdiag_matrix` buffer and `bias` flag are
        # never used in forward; they are intentionally not reproduced.

        if key is None:
            key = jax.random.PRNGKey(0)
        k1, k2, k3, k4 = jax.random.split(key, 4)
        h, s = heads, pos_scales
        p2 = 2 * s

        # nn.Parameter alpha/beta ~ N(0, 1), indexed as '(h s)'.
        self.alpha = jax.random.normal(k1, (h * s,), jnp.float32)
        self.beta = jax.random.normal(k2, (h * s,), jnp.float32)

        # Fixed positional rotation, pre-arranged for two-FMA application:
        #   ab[h, 0] = [a0, a0, a1, a1, ...]   (alpha interleaved)
        #   ab[h, 1] = [-b0, b0, -b1, b1, ...] (signed beta interleaved)
        a_hs = self.alpha.reshape(h, s)
        b_hs = self.beta.reshape(h, s)
        a_int = jnp.repeat(a_hs, 2, axis=1)                               # (h, 2s)
        b_int = jnp.stack([-b_hs, b_hs], axis=2).reshape(h, p2)           # (h, 2s)
        self._ab = jnp.stack([a_int, b_int], axis=1)                      # (h, 2, 2s)

        if content_rel_attn:
            assert in_features % heads == 0
            d = in_features // heads
            self.dim_head = d
            # nn.Linear(in_features, 2*heads*pos_scales): weight (2hs, hd), bias (2hs,)
            bound = 1.0 / math.sqrt(in_features)
            self.w_rel = jax.random.uniform(
                k3, (2 * h * s, in_features), jnp.float32, -bound, bound)
            self.b_rel = jax.random.uniform(
                k4, (2 * h * s,), jnp.float32, -bound, bound)

            # Pre-arrange the Linear so that x_flat @ Wc + bc directly yields,
            # per head block of width q = 4s:
            #   [:p2]  -> alpha_c interleaved per pair
            #   [p2:]  -> (-beta_c, +beta_c) interleaved per pair
            q = 2 * p2
            W3 = self.w_rel.reshape(h, s, 2, h * d)
            aw, bw = W3[:, :, 0, :], W3[:, :, 1, :]                       # (h, s, hd)
            p1w = jnp.repeat(aw, 2, axis=1)                               # (h, 2s, hd)
            p2w = jnp.stack([-bw, bw], axis=2).reshape(h, p2, h * d)      # (h, 2s, hd)
            wcond = jnp.concatenate([p1w, p2w], axis=1)                   # (h, q, hd)
            wc_all = wcond.transpose(2, 0, 1).reshape(h * d, h * q)       # (hd, h*q)
            # Split the contraction dim by head so the kernel reuses the
            # per-head content block (x_flat column block hh == x[hh]).
            self._wc = wc_all.reshape(h, d, h * q)
            b3 = self.b_rel.reshape(h, s, 2)
            ab_b, bb_b = b3[:, :, 0], b3[:, :, 1]
            b1 = jnp.repeat(ab_b, 2, axis=1)
            b2 = jnp.stack([-bb_b, bb_b], axis=2).reshape(h, p2)
            self._bc = jnp.concatenate([b1, b2], axis=1).reshape(1, h * q)

    def __call__(self, x, pos_encodings):
        b, h, n, d = x.shape
        assert h == self.heads
        s = self.pos_scales
        p2 = 2 * s
        dt = x.dtype

        bp = pos_encodings.shape[0]
        assert pos_encodings.shape[1:] == (n, p2)
        assert bp in (1, b)
        pos = pos_encodings.astype(dt)
        # Fuse pos and its pair-swapped copy into ONE small DMA stream per step;
        # the swap lets the 2x2 rotation run as two VPU FMAs (no in-kernel
        # cross-lane shuffles).  Batch-1 pos is broadcast by the index_map.
        pos_sw = pos.reshape(bp, n, s, 2)[..., ::-1].reshape(bp, n, p2)
        pcat = jnp.concatenate([pos, pos_sw], axis=-1)                    # (bp, n, 2*p2)

        rel = self.content_rel_attn
        od = d + (2 * p2 if rel else p2)
        q = 2 * p2

        # --- VMEM-budget- and generation-aware tile selection ----------------
        esz = jnp.dtype(dt).itemsize
        align = 8 if esz >= 4 else 16
        row_bytes = 2 * esz * (h * d + 2 * p2 + h * od)      # double-buffered streams
        const_bytes = 2 * 4 * h * 2 * p2
        if rel:
            const_bytes += 2 * (esz * h * d * h * q + 4 * h * q)
        try:
            vmem_cap = pltpu.get_tpu_info().vmem_capacity_bytes
        except Exception:
            vmem_cap = 64 << 20
        # v7x-class chips have 64 MiB VMEM per TensorCore -> smaller budget.
        budget = (40 << 20) if vmem_cap <= (64 << 20) else (64 << 20)

        avail = budget - const_bytes - (4 << 20)              # headroom for temps
        tn = int(max(align, min(512, (avail // max(row_bytes, 1)) // align * align)))
        if n <= tn:
            tn = n
        n_tiles = -(-n // tn)
        # v7x has two TensorCores per chip: expose >= 2 parallel grid steps.
        if b * n_tiles < 2 and n >= 2 * align:
            tn = int(max(align, ((n + 1) // 2 + align - 1) // align * align))
            n_tiles = -(-n // tn)
        est = row_bytes * tn + const_bytes + (4 << 20)
        vmem_limit = int(min(max(budget, est), int(vmem_cap * 0.9)))

        grid = (b, n_tiles)
        pcat_idx = ((lambda bi, ni: (0, ni, 0)) if bp == 1
                    else (lambda bi, ni: (bi, ni, 0)))

        x_spec = pl.BlockSpec((None, h, tn, d), lambda bi, ni: (bi, 0, ni, 0))
        p_spec = pl.BlockSpec((None, tn, 2 * p2), pcat_idx)
        ab_spec = pl.BlockSpec((h, 2, p2), lambda bi, ni: (0, 0, 0))
        out_spec = pl.BlockSpec((None, h, tn, od), lambda bi, ni: (bi, 0, ni, 0))

        ab = self._ab.astype(dt)

        if rel:
            assert h * d == self.in_features, "content_rel_attn requires h*d == in_features"
            kern = partial(_cl_rel_kernel, heads=h, p2=p2, d=d)
            in_specs = [x_spec, p_spec, ab_spec,
                        pl.BlockSpec((h, d, h * q), lambda bi, ni: (0, 0, 0)),
                        pl.BlockSpec((1, h * q), lambda bi, ni: (0, 0))]
            args = (x, pcat, ab, self._wc.astype(dt), self._bc)
        else:
            kern = partial(_cl_pos_kernel, p2=p2, d=d)
            in_specs = [x_spec, p_spec, ab_spec]
            args = (x, pcat, ab)

        return pl.pallas_call(
            kern,
            grid=grid,
            in_specs=in_specs,
            out_specs=out_spec,
            out_shape=jax.ShapeDtypeStruct((b, h, n, od), dt),
            compiler_params=pltpu.CompilerParams(
                dimension_semantics=("parallel", "parallel"),
                vmem_limit_bytes=vmem_limit),
        )(*args)


# ----------------------------------------------------------------------------
# Pure-JAX reference (mirrors the PyTorch forward) for a correctness check
# ----------------------------------------------------------------------------
def reference_forward(mod, x, pos):
    x = x.astype(jnp.float32)
    pos = pos.astype(jnp.float32)
    b, h, n, d = x.shape
    s = mod.pos_scales
    if pos.shape[0] != b:
        pos = jnp.broadcast_to(pos, (b,) + pos.shape[1:])
    alpha = mod.alpha.reshape(h, s)
    beta = mod.beta.reshape(h, s)
    M = jnp.stack([alpha, beta, -beta, alpha], axis=-1).reshape(h, s, 2, 2)
    pos_r = pos.reshape(b, n, s, 2)
    pb = jnp.einsum('bnse,hsef->bhnsf', pos_r, M).reshape(b, h, n, 2 * s)
    if not mod.content_rel_attn:
        return jnp.concatenate([x, pb], axis=-1)
    x_flat = x.transpose(0, 2, 1, 3).reshape(b, n, h * d)
    lin = x_flat @ mod.w_rel.T + mod.b_rel
    pars = lin.reshape(b, n, h, s, 2).transpose(0, 2, 1, 3, 4)   # (b, h, n, s, 2)
    ac, bc = pars[..., 0], pars[..., 1]
    Mc = jnp.stack([ac, bc, -bc, ac], axis=-1).reshape(b, h, n, s, 2, 2)
    cr = jnp.einsum('bnse,bhnsef->bhnsf', pos_r, Mc).reshape(b, h, n, 2 * s)
    return jnp.concatenate([x, cr, pb], axis=-1)


if __name__ == "__main__":
    key = jax.random.PRNGKey(0)
    k_param, k_x, k_pos = jax.random.split(key, 3)

    heads, scales, d_head = 4, 4, 8
    in_features = heads * d_head            # 32
    B, N = 2, 8

    x = jax.random.normal(k_x, (B, heads, N, d_head), jnp.float32)
    pos = jax.random.normal(k_pos, (B, N, 2 * scales), jnp.float32)
    pos1 = pos[:1]                          # batch-1 positional encodings

    # content_rel_attn=False (default) path
    mod_plain = ConstrainedLinearPallas(in_features, in_features, scales, heads,
                                        content_rel_attn=False, key=k_param)
    out_plain = jax.block_until_ready(mod_plain(x, pos))
    assert out_plain.shape == (B, heads, N, d_head + 2 * scales), out_plain.shape
    assert out_plain.dtype == x.dtype
    ref_plain = jax.block_until_ready(reference_forward(mod_plain, x, pos))
    diff_plain = float(jnp.max(jnp.abs(out_plain - ref_plain)))
    assert diff_plain < 1e-3, f"plain path mismatch: max |diff| = {diff_plain}"

    # content_rel_attn=True path, with batch-1 pos (index-map broadcast)
    mod_rel = ConstrainedLinearPallas(in_features, in_features, scales, heads,
                                      content_rel_attn=True, key=k_param)
    out_rel = jax.block_until_ready(mod_rel(x, pos1))
    assert out_rel.shape == (B, heads, N, d_head + 4 * scales), out_rel.shape
    ref_rel = jax.block_until_ready(reference_forward(mod_rel, x, pos1))
    diff_rel = float(jnp.max(jnp.abs(out_rel - ref_rel)))
    assert diff_rel < 1e-3, f"rel path mismatch: max |diff| = {diff_rel}"

    # bf16 I/O path: dtype is preserved end-to-end (loose tolerance vs f32 ref)
    out_bf = jax.block_until_ready(
        mod_plain(x.astype(jnp.bfloat16), pos.astype(jnp.bfloat16)))
    assert out_bf.dtype == jnp.bfloat16 and out_bf.shape == out_plain.shape
    diff_bf = float(jnp.max(jnp.abs(out_bf.astype(jnp.float32) - ref_plain)))
    assert diff_bf < 0.5, f"bf16 path mismatch: max |diff| = {diff_bf}"

    print("KERNEL_OK")
</pallas_src>

<mosaic_0001>
module attributes {stable_mosaic.version = 11 : i64} {
  func.func @_cl_pos_kernel(%arg0: i32, %arg1: i32, %arg2: memref<1x4x8x8xf32, #tpu.memory_space<vmem>>, %arg3: memref<1x8x16xf32, #tpu.memory_space<vmem>>, %arg4: memref<4x2x8xf32, #tpu.memory_space<vmem>>, %arg5: memref<1x4x8x16xf32, #tpu.memory_space<vmem>>) attributes {dimension_semantics = [#tpu.dimension_semantics<parallel>, #tpu.dimension_semantics<parallel>], iteration_bounds = array<i64: 2, 1>, scalar_prefetch = 0 : i64, scratch_operands = 0 : i64, tpu.core_type = #tpu.core_type<tc>, window_params = [{transform_indices = @transform_0, window_bounds = array<i64: 1, 4, 8, 8>}, {transform_indices = @transform_1, window_bounds = array<i64: 1, 8, 16>}, {pipeline_mode = #tpu.pipeline_mode<synchronous>, transform_indices = @transform_2, window_bounds = array<i64: 4, 2, 8>}, {transform_indices = @transform_3, window_bounds = array<i64: 1, 4, 8, 16>}]} {
    %c0 = arith.constant 0 : index
    %c0_0 = arith.constant 0 : index
    %c0_1 = arith.constant 0 : index
    %c0_2 = arith.constant 0 : index
    %0 = vector.load %arg2[%c0, %c0_0, %c0_1, %c0_2] : memref<1x4x8x8xf32, #tpu.memory_space<vmem>>, vector<1x4x8x8xf32>
    %1 = vector.shape_cast %0 : vector<1x4x8x8xf32> to vector<4x8x8xf32>
    %c0_3 = arith.constant 0 : index
    %c0_4 = arith.constant 0 : index
    %c0_5 = arith.constant 0 : index
    %2 = vector.load %arg3[%c0_3, %c0_4, %c0_5] : memref<1x8x16xf32, #tpu.memory_space<vmem>>, vector<1x8x16xf32>
    %3 = vector.shape_cast %2 : vector<1x8x16xf32> to vector<8x16xf32>
    %4 = vector.extract_strided_slice %3 {offsets = [0, 0], sizes = [8, 8], strides = [1, 1]} : vector<8x16xf32> to vector<8x8xf32>
    %5 = vector.extract_strided_slice %3 {offsets = [0, 8], sizes = [8, 8], strides = [1, 1]} : vector<8x16xf32> to vector<8x8xf32>
    %c0_6 = arith.constant 0 : index
    %c0_7 = arith.constant 0 : index
    %c0_8 = arith.constant 0 : index
    %6 = vector.load %arg4[%c0_6, %c0_7, %c0_8] : memref<4x2x8xf32, #tpu.memory_space<vmem>>, vector<4x2x8xf32>
    %7 = vector.shape_cast %4 : vector<8x8xf32> to vector<1x8x8xf32>
    %8 = vector.extract_strided_slice %6 {offsets = [0, 0, 0], sizes = [4, 1, 8], strides = [1, 1, 1]} : vector<4x2x8xf32> to vector<4x1x8xf32>
    %9 = vector.broadcast %7 : vector<1x8x8xf32> to vector<4x8x8xf32>
    %10 = vector.broadcast %8 : vector<4x1x8xf32> to vector<4x8x8xf32>
    %11 = arith.mulf %9, %10 : vector<4x8x8xf32>
    %12 = vector.shape_cast %5 : vector<8x8xf32> to vector<1x8x8xf32>
    %13 = vector.extract_strided_slice %6 {offsets = [0, 1, 0], sizes = [4, 1, 8], strides = [1, 1, 1]} : vector<4x2x8xf32> to vector<4x1x8xf32>
    %14 = vector.broadcast %12 : vector<1x8x8xf32> to vector<4x8x8xf32>
    %15 = vector.broadcast %13 : vector<4x1x8xf32> to vector<4x8x8xf32>
    %16 = arith.mulf %14, %15 : vector<4x8x8xf32>
    %17 = arith.addf %11, %16 : vector<4x8x8xf32>
    %c0_9 = arith.constant 0 : index
    %c0_10 = arith.constant 0 : index
    %c0_11 = arith.constant 0 : index
    %c0_12 = arith.constant 0 : index
    %18 = vector.load %arg5[%c0_9, %c0_10, %c0_11, %c0_12] : memref<1x4x8x16xf32, #tpu.memory_space<vmem>>, vector<1x4x8x8xf32>
    %19 = vector.shape_cast %18 : vector<1x4x8x8xf32> to vector<4x8x8xf32>
    %20 = vector.shape_cast %1 : vector<4x8x8xf32> to vector<1x4x8x8xf32>
    tpu.vector_store %arg5[%c0_9, %c0_10, %c0_11, %c0_12], %20 {strides = array<i32>} : memref<1x4x8x16xf32, #tpu.memory_space<vmem>>, vector<1x4x8x8xf32>,
    %c0_13 = arith.constant 0 : index
    %c0_14 = arith.constant 0 : index
    %c0_15 = arith.constant 0 : index
    %c8 = arith.constant 8 : index
    %21 = vector.load %arg5[%c0_13, %c0_14, %c0_15, %c8] : memref<1x4x8x16xf32, #tpu.memory_space<vmem>>, vector<1x4x8x8xf32>
    %22 = vector.shape_cast %21 : vector<1x4x8x8xf32> to vector<4x8x8xf32>
    %23 = vector.shape_cast %17 : vector<4x8x8xf32> to vector<1x4x8x8xf32>
    tpu.vector_store %arg5[%c0_13, %c0_14, %c0_15, %c8], %23 {strides = array<i32>} : memref<1x4x8x16xf32, #tpu.memory_space<vmem>>, vector<1x4x8x8xf32>,
    return
  }
  func.func @transform_0(%arg0: i32, %arg1: i32) -> (i32, i32, i32, i32) {
    %c0_i32 = arith.constant 0 : i32
    %c0_i32_0 = arith.constant 0 : i32
    %c0_i32_1 = arith.constant 0 : i32
    return %arg0, %c0_i32, %arg1, %c0_i32_0 : i32, i32, i32, i32
  }
  func.func @transform_1(%arg0: i32, %arg1: i32) -> (i32, i32, i32) {
    %c0_i32 = arith.constant 0 : i32
    %c0_i32_0 = arith.constant 0 : i32
    return %arg0, %arg1, %c0_i32 : i32, i32, i32
  }
  func.func @transform_2(%arg0: i32, %arg1: i32) -> (i32, i32, i32) {
    %c0_i32 = arith.constant 0 : i32
    %c0_i32_0 = arith.constant 0 : i32
    %c0_i32_1 = arith.constant 0 : i32
    %c0_i32_2 = arith.constant 0 : i32
    return %c0_i32, %c0_i32_0, %c0_i32_1 : i32, i32, i32
  }
  func.func @transform_3(%arg0: i32, %arg1: i32) -> (i32, i32, i32, i32) {
    %c0_i32 = arith.constant 0 : i32
    %c0_i32_0 = arith.constant 0 : i32
    %c0_i32_1 = arith.constant 0 : i32
    return %arg0, %c0_i32, %arg1, %c0_i32_0 : i32, i32, i32, i32
  }
}

</mosaic_0001>

<bundles_post_ra>
// kernel: tpu_custom_call.1
= control target key start
LH: loop header
LB: loop body
LE: loop exit
PB: predicated region body
PF: predicated region fallthrough
CT: control target
= control target key end

     0   :  { %s1105_s0 = inlined_call_operand.hbm [shape: f32[2,4,8,8], index: 0, kind: input, shape index: {}]   ;;  %s1106_s1 = inlined_call_operand.hbm [shape: f32[2,8,16], index: 1, kind: input, shape index: {}]   ;;  %s1107_s2 = inlined_call_operand.hbm [shape: f32[4,2,8], index: 2, kind: input, shape index: {}]   ;;  %s1108_s3 = inlined_call_operand.hbm [shape: f32[2,4,8,16], index: 3, kind: output, shape index: {}]  }
   0x1   :  { %1114 = sst [smem:[#allocation14_spill]] %s1105_s0 }
   0x2   :  { %1115 = sst [smem:[#allocation15_spill]] %s1107_s2 }
   0x3   :  { %8 = vsyncpa [#allocation3], 0 }
   0x4   :  { %10 = vsyncpa [#allocation3 + $0x1], 0 }
   0x5   :  { %11 = vsyncpa [#allocation6], 0 }
   0x6   :  { %13 = vsyncpa [#allocation6 + $0x1], 0 }
   0x7   :  { %14 = vsyncpa [#allocation4], 0 }
   0x8   :  { %16 = vsyncpa [#allocation4 + $0x1], 0  ;;  %s822_s12 = smov 0   ;;  %s824_s13 = smov 0  }
   0x9   :  { %s826_s14 = smov 0   ;;  %s828_s15 = smov 0  }
   0xa   :  { %s830_s16 = smov 0   ;;  %s832_s17 = smov 0  }
   0xb LB: > { %s853_s18 = sadd.s32 4294967295, %s789_s17   ;;  %s505_s19 = sadd.s32 4294967294, %s789_s17   ;;  %s789_s17 = sphi %s832_s17, %s22_s17   ;;  %s785_s16 = sphi %s830_s16, %s1140_s16   ;;  %s781_s15 = sphi %s828_s15, %s1139_s15   ;;  %s777_s14 = sphi %s826_s14, %s1138_s14   ;;  %s773_s13 = sphi %s824_s13, %s1137_s13   ;;  %s769_s12 = sphi %s822_s12, %s1136_s12  }
   0xc   : > { %p56_p0 = scmp.ne.s32.totalorder %s773_s13, %s769_s12  ;;  %p1109_p1 = scmp.eq.s32.totalorder %s853_s18, 0 }
   0xd   : > { %p137_p3 = scmp.eq.s32.totalorder %s505_s19, 1  ;;  %p506_p5 = scmp.ge.s32.totalorder %s789_s17, 1 }
   0xe   : > { %p862_p4 = por %p1109_p1, %p56_p0  ;;  %p144_p7 = scmp.lt.s32.totalorder %s789_s17, 3 }
   0xf   : > { %p867_p6 = por %p137_p3, %p56_p0  ;;  %s791_s23 = smov [#allocation7]  }
  0x10   : > { %s1116_s20 = scalar_select %p862_p4, 1, 0 }
  0x11   : > { %s1117_s21 = scalar_select %p867_p6, 1, 0 }
  0x12   : > { %p872_p8 = pnand %p506_p5, %p144_p7  ;;  %s156_s24 = sshll.u32 %s791_s23, 4  ;;  %s157_s24 = int_to_ptr.vmem [resolvable:$true] %s156_s24 }
  0x13   : > { %s34_s26 = sadd.s32 1, %s785_s16  ;;  %s1120_s2 = sld [smem:[#allocation15_spill]] }
  0x14   : > { %s1118_s22 = scalar_select %p872_p8, 1, 0 }
  0x15   : > { %p536_p9 = pneg %p872_p8 }
  0x17   : > { %p881_p11 = pnand %p536_p9, %p1109_p1 }
  0x19   : > { %s611_s29 = scalar_lea.hbm %s1120_s2, 128  ;;  %p613_p13 = pneg %p881_p11 }
  0x1a   : > { %p612_p12 = scmp.ne.s32.totalorder %s1120_s2, %s611_s29  ;;  %p618_p5 = scmp.lt.u32.totalorder %s611_s29, %s1120_s2 }
  0x1c   : > { %p614_p0 = pnand %p613_p13, %p612_p12 }
  0x1e   : > { %p615_p3 = pneg %p614_p0 }
  0x20   : > { %p620_p7 = pnand %p618_p5, %p615_p3 }
  0x22   : > { %623 = shalt.err (!%p620_p7)
}
  0x23   : > { %s624_s7 = scalar_lea.vmem %s157_s24, 128  ;;  %p632_p2 = scmp.lt.s32.totalorder %s157_s24, %s157_s24 }
  0x24   : > { %p625_p9 = scmp.ne.s32.totalorder %s157_s24, %s624_s7  ;;  %p633_p6 = scmp.lt.s32.totalorder %s624_s7, %s624_s7 }
  0x26   : > { %p627_p10 = pnand %p625_p9, %p613_p13  ;;  %p634_p4 = por %p633_p6, %p632_p2 }
  0x28   : > { %p628_p1 = pneg %p627_p10 }
  0x2a   : > { %p635_p8 = pnand %p634_p4, %p628_p1 }
  0x2c   : > { %638 = shalt.err (!%p635_p8)
}
  0x2d   : > { %s792_s8 = smov 32   ;;  %s793_s9 = smov 2  }
  0x2e   : > { %539 = dma.hbm_to_vmem [thread:$0]  (!%p881_p11), %s1120_s2, 128, %s157_s24, [#allocation6], %s792_s8, %s792_s8, %s793_s9  }
  0x2f   : > { %p36_p1 = scmp.ge.s32.totalorder %s34_s26, 2  ;;  %s43_s19 = sadd.s32 1, %s777_s14 }
  0x30   : > { %p50_p2 = scmp.ne.s32.totalorder %s777_s14, %s773_s13  ;;  %p51_p4 = scmp.eq.s32.totalorder %s789_s17, 0 }
  0x31   : > { %s1142_s26 = smov (%p36_p1, %s34_s26), 0  ;;  %p1123_p8 = scmp.eq.s32.totalorder %s853_s18, 1 }
  0x32   : > { %1121 = sst [smem:[#allocation13_spill]] %s1142_s26  ;;  %p908_p6 = por %p51_p4, %p50_p2 }
  0x33   : > { %p914_p10 = por %p1123_p8, %p50_p2  ;;  %s38_s27 = ssub.s32 %s785_s16, %s1142_s26 }
  0x34   : > { %p552_p11 = scmp.lt.s32.totalorder %s789_s17, 2  ;;  %p41_p12 = scmp.eq.s32.totalorder %s38_s27, 0 }
  0x35   : > { %s1124_s25 = scalar_select %p914_p10, 1, 0 }
  0x36   : > { %s922_s24 = sand.u32 1, %s777_s14   ;;  %s524_s30 = sshll.u32 %s785_s16, 9 }
  0x37   : > { %s509_s28 = sshll.u32 %s922_s24, 5  ;;  %s1125_s0 = sld [smem:[#allocation14_spill]] }
  0x38   : > { %s926_s29 = scalar_select %p41_p12, %s777_s14, %s43_s19  }
  0x39   : > { %s174_s7 = scalar_lea.vmem [#allocation2], %s509_s28  ;;  %p938_p13 = pnand %p552_p11, %p908_p6 }
  0x3a   : > { %s182_s8 = sshll.u32 %s174_s7, 4  ;;  %s171_s11 = scalar_lea.sflag [#allocation3], %s922_s24  ;;  %s934_s8 = int_to_ptr.vmem [resolvable:$true] %s182_s8 }
  0x3b   : > { %p641_p3 = pneg %p938_p13 }
  0x3d   : > { %s932_s6 = scalar_lea.hbm %s1125_s0, %s524_s30  ;;  %s644_s23 = scalar_lea.hbm %s1125_s0, 1024 }
  0x3e   : > { %s639_s19 = scalar_lea.hbm %s932_s6, 512  ;;  %p645_p9 = scmp.lt.u32.totalorder %s932_s6, %s1125_s0 }
  0x3f   : > { %p640_p0 = scmp.ne.s32.totalorder %s932_s6, %s639_s19  ;;  %p646_p1 = scmp.lt.u32.totalorder %s644_s23, %s639_s19 }
  0x40   : > { %p648_p4 = scmp.lt.u32.totalorder %s639_s19, %s932_s6 }
  0x41   : > { %p642_p5 = pnand %p641_p3, %p640_p0  ;;  %p647_p2 = por %p646_p1, %p645_p9 }
  0x43   : > { %p643_p7 = pneg %p642_p5  ;;  %p649_p6 = por %p648_p4, %p647_p2 }
  0x45   : > { %p650_p8 = pnand %p649_p6, %p643_p7 }
  0x47   : > { %653 = shalt.err (!%p650_p8)
}
  0x48   : > { %s654_s5 = scalar_lea.vmem %s934_s8, 512  ;;  %s794_s7 = smov [#allocation2]  }
  0x49   : > { %p655_p11 = scmp.ne.s32.totalorder %s934_s8, %s654_s5  ;;  %s659_s27 = sshll.u32 %s794_s7, 4  ;;  %s660_s27 = int_to_ptr.vmem [resolvable:$false] %s659_s27 }
  0x4a   : > { %s661_s28 = scalar_lea.vmem %s660_s27, 1024  ;;  %p662_p5 = scmp.lt.s32.totalorder %s934_s8, %s660_s27 }
  0x4b   : > { %p657_p12 = pnand %p655_p11, %p641_p3  ;;  %p663_p9 = scmp.lt.s32.totalorder %s661_s28, %s654_s5 }
  0x4d   : > { %p658_p0 = pneg %p657_p12  ;;  %p664_p1 = por %p663_p9, %p662_p5 }
  0x4f   : > { %p665_p2 = pnand %p664_p1, %p658_p0 }
  0x51   : > { %668 = shalt.err (!%p665_p2)
}
  0x52   : > { %s795_s19 = smov 128   ;;  %s796_s23 = smov 8  }
  0x53   : > { %543 = dma.hbm_to_vmem [thread:$0]  (!%p938_p13), %s932_s6, 512, %s934_s8, %s171_s11, %s795_s19, %s795_s19, %s796_s23  }
  0x54   : > { %s512_s30 = sshll.u32 %s922_s24, 3  ;;  %s513_s4 = sshll.u32 %s785_s16, 7 }
  0x55   : > { %s976_s27 = scalar_lea.hbm %s1106_s1, %s513_s4  ;;  %s196_s28 = scalar_lea.vmem [#allocation5], %s512_s30 }
  0x56   : > { %s204_s10 = sshll.u32 %s196_s28, 4  ;;  %s1127_s0 = sand.u32 1, %s789_s17   ;;  %s205_s10 = int_to_ptr.vmem [resolvable:$true] %s204_s10 }
  0x57   : > { %s193_s2 = scalar_lea.sflag [#allocation6], %s1127_s0  ;;  %s669_s26 = scalar_lea.hbm %s976_s27, 128 }
  0x58   : > { %p670_p7 = scmp.ne.s32.totalorder %s976_s27, %s669_s26  ;;  %s674_s8 = scalar_lea.hbm %s1106_s1, 256 }
  0x59   : > { %p675_p8 = scmp.lt.u32.totalorder %s976_s27, %s1106_s1  ;;  %p676_p11 = scmp.lt.u32.totalorder %s674_s8, %s669_s26 }
  0x5a   : > { %p672_p4 = pnand %p670_p7, %p641_p3  ;;  %p678_p0 = scmp.lt.u32.totalorder %s669_s26, %s976_s27 }
  0x5b   : > { %p677_p12 = por %p676_p11, %p675_p8 }
  0x5c   : > { %p673_p6 = pneg %p672_p4 }
  0x5d   : > { %p679_p5 = por %p678_p0, %p677_p12 }
  0x5f   : > { %p680_p9 = pnand %p679_p5, %p673_p6 }
  0x61   : > { %683 = shalt.err (!%p680_p9)
}
  0x62   : > { %s684_s0 = scalar_lea.vmem %s205_s10, 128  ;;  %s797_s23 = smov [#allocation5]  }
  0x63   : > { %p685_p1 = scmp.ne.s32.totalorder %s205_s10, %s684_s0  ;;  %s689_s30 = sshll.u32 %s797_s23, 4  ;;  %s690_s30 = int_to_ptr.vmem [resolvable:$false] %s689_s30 }
  0x64   : > { %s691_s4 = scalar_lea.vmem %s690_s30, 256  ;;  %p692_p4 = scmp.lt.s32.totalorder %s205_s10, %s690_s30 }
  0x65   : > { %p687_p2 = pnand %p685_p1, %p641_p3  ;;  %p693_p10 = scmp.lt.s32.totalorder %s691_s4, %s684_s0 }
  0x67   : > { %p688_p7 = pneg %p687_p2  ;;  %p694_p8 = por %p693_p10, %p692_p4 }
  0x69   : > { %p695_p11 = pnand %p694_p8, %p688_p7 }
  0x6b   : > { %698 = shalt.err (!%p695_p11)
}
  0x6c   : > { %546 = dma.hbm_to_vmem [thread:$0]  (!%p938_p13), %s976_s27, 128, %s205_s10, %s193_s2  }
  0x6d   : > { %p1128_p6 = scmp.ne.s32.totalorder %s1118_s22, 0 }
  0x6e   : > { %s1002_s26 = sand.u32 (!%p1128_p6), 1, %s773_s13   ;;  %p1129_p10 = scmp.ne.s32.totalorder (!%p1128_p6), %s1116_s20, 0 }
  0x6f   : > { %213 = sbr.rel (%p1128_p6) target bundleno = 505 (0x1f9), region = 32  ;;  %s515_s7 = sshll.u32 (!%p1128_p6), %s1002_s26, 5 }
  0x70   : > { %s216_s5 = scalar_lea.sflag (!%p1128_p6), [#allocation3], %s1002_s26  ;;  %s1008_s28 = scalar_lea.vmem (!%p1128_p6), [#allocation2], %s515_s7 }
  0x76   : > { %752 = dma.done.wait (%p1129_p10), %s216_s5, 512  }
  0x77   : > { %754 = vsyncadd (%p1129_p10), %s216_s5, 4294966784  ;;  %s224_s2 = sand.u32 1, %s853_s18   ;;  %s516_s22 = sshll.u32 %s1002_s26, 3 }
  0x78   : > { %s225_s9 = scalar_lea.sflag [#allocation6], %s224_s2  ;;  %s228_s10 = scalar_lea.vmem [#allocation5], %s516_s22 }
  0x79   : > { %756 = dma.done.wait (%p1129_p10), %s225_s9, 128  }
  0x7a   : > { %758 = vsyncadd (%p1129_p10), %s225_s9, 4294967168  ;;  %p1130_p13 = scmp.eq.s32.totalorder %s853_s18, 0 }
  0x7c   : > { %760 = dma.done.wait (%p1130_p13), [#allocation6], 128   ;;  %p1131_p3 = pmov %p1130_p13 }
  0x7d   : > { %v269_v0 = vlaneseq  ;;  %v265_v4 = vld [vmem:[#allocation7] sm:$0x3]  ;;  %v267_v5 = vld [vmem:[#allocation7 + $0x4] sm:$0x3]  ;;  %v266_v6 = vld [vmem:[#allocation7 + $0x2] sm:$0x3] }
  0x7e   : > { %762 = vsyncadd (%p1131_p3), [#allocation6], 4294967168  ;;  %v268_v11 = vld [vmem:[#allocation7 + $0x6] sm:$0x3]  ;;  %s798_s20 = smov 8   ;;  %v264_v14 = vld [vmem:[%s228_s10] sm:$0xff] }
  0x7f   : > { %v270_v1 = vshrl.u32 %v269_v0, 7  ;;  %s799_s18 = smov 120   ;;  %vm345_vm0 = vcmask 64512   ;;  %v260_v29 = vld [vmem:[%s1008_s28] sm:$0xff]  ;;  %s1031_s27 = scalar_lea.vmem [#allocation8], %s515_s7  ;;  %v261_v30 = vld [vmem:[%s1008_s28 + $0x8] sm:$0xff] }
  0x80   : > { %346 = vst.msk [vmem:[%s1031_s27] sm:$0xff] %vm345_vm0, %v260_v29  ;;  %v262_v31 = vld [vmem:[%s1008_s28 + $0x10] sm:$0xff]  ;;  %347 = vst.msk [vmem:[%s1031_s27 + $0x8] sm:$0xff] %vm345_vm0, %v261_v30  ;;  %v263_v32 = vld [vmem:[%s1008_s28 + $0x18] sm:$0xff]  ;;  %vm366_vm1 = vcmask 130112   ;;  %s525_s24 = sshll.u32 %s781_s15, 9 }
  0x81   : > { %v271_v2 = vsub.s32 0, %v270_v1  ;;  %v291_v3 = vsub.s32 1, %v270_v1  ;;  %348 = vst.msk [vmem:[%s1031_s27 + $0x10] sm:$0xff] %vm345_vm0, %v262_v31  ;;  %349 = vst.msk [vmem:[%s1031_s27 + $0x18] sm:$0xff] %vm345_vm0, %v263_v32  ;;  %s386_s6 = sshll.u32 %s1031_s27, 4  ;;  %s1052_s19 = scalar_lea.hbm %s1108_s3, %s525_s24  ;;  %s1054_s6 = int_to_ptr.vmem [resolvable:$true] %s386_s6 }
  0x82   : > { %s372_s0 = scalar_lea.sflag [#allocation4], %s1002_s26  ;;  %s699_s23 = scalar_lea.vmem %s1054_s6, 512 }
  0x83   : > { %v292_v7 = vrot.slane %v265_v4, %v291_v3  ;;  %v272_v8 = vrot.slane %v265_v4, %v271_v2  ;;  %v300_v9 = vrot.slane %v267_v5, %v291_v3  ;;  %v280_v10 = vrot.slane %v267_v5, %v271_v2  ;;  %p700_p12 = scmp.ne.s32.totalorder %s1054_s6, %s699_s23  ;;  %p1132_p0 = scmp.ne.s32.totalorder %s1124_s25, 0 }
  0x84   : > { %v296_v12 = vrot.slane %v266_v6, %v291_v3  ;;  %v304_v13 = vrot.slane %v268_v11, %v291_v3  ;;  %v276_v16 = vrot.slane %v266_v6, %v271_v2  ;;  %v284_v19 = vrot.slane %v268_v11, %v271_v2  ;;  %s800_s15 = smov [#allocation8]  }
  0x85   : > { %309 = vrot.lane.b32.xlu0 %v292_v7, %s798_s20  ;;  %313 = vrot.lane.b32.xlu1 %v300_v9, %s798_s20  ;;  %v285_v15 = vmul.f32 %v272_v8, %v264_v14  ;;  %v287_v18 = vmul.f32 %v280_v10, %v264_v14  ;;  %p701_p5 = pnand %p700_p12, %p1132_p0  ;;  %s703_s30 = sshll.u32 %s800_s15, 4  ;;  %s704_s30 = int_to_ptr.vmem [resolvable:$false] %s703_s30 }
  0x86   : > { %v286_v17 = vmul.f32 %v276_v16, %v264_v14  ;;  %v288_v20 = vmul.f32 %v284_v19, %v264_v14  ;;  %s705_s4 = scalar_lea.vmem %s704_s30, 1024  ;;  %p706_p1 = scmp.lt.s32.totalorder %s1054_s6, %s704_s30 }
  0x87   : > { %p702_p9 = pneg %p701_p5  ;;  %p707_p2 = scmp.lt.s32.totalorder %s705_s4, %s699_s23 }
  0x89   : > { %311 = vrot.lane.b32.xlu0 %v296_v12, %s798_s20  ;;  %315 = vrot.lane.b32.xlu1 %v304_v13, %s798_s20  ;;  %p708_p7 = por %p707_p2, %p706_p1 }
  0x8b   : > { %p709_p4 = pnand %p708_p7, %p702_p9 }
  0xf7   : > { %v310_v21 = vpop.permute.xlu0 %309  ;;  %v314_v22 = vpop.permute.xlu1 %313 }
  0xf8   : > { %v321_v23 = vmul.f32 %v310_v21, %v264_v14  ;;  %v323_v24 = vmul.f32 %v314_v22, %v264_v14 }
  0xfa   : > { %329 = vrot.lane.b32.xlu0 %v321_v23, %s799_s18 }
  0xfb   : > { %v312_v25 = vpop.permute.xlu0 %311  ;;  %v316_v26 = vpop.permute.xlu1 %315 }
  0xfc   : > { %v322_v27 = vmul.f32 %v312_v25, %v264_v14  ;;  %v324_v28 = vmul.f32 %v316_v26, %v264_v14 }
  0xfe   : > { %331 = vrot.lane.b32.xlu1 %v322_v27, %s799_s18  ;;  %333 = vrot.lane.b32.xlu0 %v323_v24, %s799_s18 }
 0x102   : > { %335 = vrot.lane.b32.xlu1 %v324_v28, %s799_s18 }
 0x16c   : > { %v330_v33 = vpop.permute.xlu0 %329 }
 0x16d   : > { %v341_v34 = vadd.f32 %v330_v33, %v285_v15 }
 0x16f   : > { %354 = vrot.lane.b32.xlu0 %v341_v34, %s798_s20 }
 0x170   : > { %v332_v35 = vpop.permute.xlu1 %331  ;;  %v334_v36 = vpop.permute.xlu0 %333 }
 0x171   : > { %v342_v37 = vadd.f32 %v332_v35, %v286_v17  ;;  %v343_v38 = vadd.f32 %v334_v36, %v287_v18 }
 0x173   : > { %356 = vrot.lane.b32.xlu1 %v342_v37, %s798_s20  ;;  %358 = vrot.lane.b32.xlu0 %v343_v38, %s798_s20 }
 0x174   : > { %v336_v39 = vpop.permute.xlu1 %335 }
 0x175   : > { %v344_v40 = vadd.f32 %v336_v39, %v288_v20 }
 0x177   : > { %360 = vrot.lane.b32.xlu1 %v344_v40, %s798_s20 }
 0x1e1   : > { %v355_v41 = vpop.permute.xlu0 %354 }
 0x1e2   : > { %367 = vst.msk [vmem:[%s1031_s27] sm:$0xff] %vm366_vm1, %v355_v41 }
 0x1e5   : > { %v357_v42 = vpop.permute.xlu1 %356  ;;  %v359_v43 = vpop.permute.xlu0 %358 }
 0x1e6   : > { %368 = vst.msk [vmem:[%s1031_s27 + $0x8] sm:$0xff] %vm366_vm1, %v357_v42  ;;  %369 = vst.msk [vmem:[%s1031_s27 + $0x10] sm:$0xff] %vm366_vm1, %v359_v43 }
 0x1e9   : > { %v361_v44 = vpop.permute.xlu1 %360 }
 0x1ea   : > { %370 = vst.msk [vmem:[%s1031_s27 + $0x18] sm:$0xff] %vm366_vm1, %v361_v44 }
 0x1eb   : > { %712 = shalt.err (!%p709_p4)
}
 0x1ec   : > { %s713_s7 = scalar_lea.hbm %s1052_s19, 512  ;;  %s717_s2 = scalar_lea.hbm %s1108_s3, 1024 }
 0x1ed   : > { %p714_p8 = scmp.ne.s32.totalorder %s1052_s19, %s713_s7  ;;  %p718_p10 = scmp.lt.u32.totalorder %s1052_s19, %s1108_s3 }
 0x1ee   : > { %p719_p13 = scmp.lt.u32.totalorder %s717_s2, %s713_s7  ;;  %p721_p12 = scmp.lt.u32.totalorder %s713_s7, %s1052_s19 }
 0x1ef   : > { %p715_p11 = pnand %p714_p8, %p1132_p0 }
 0x1f0   : > { %p720_p3 = por %p719_p13, %p718_p10 }
 0x1f1   : > { %p716_p6 = pneg %p715_p11 }
 0x1f2   : > { %p722_p5 = por %p721_p12, %p720_p3 }
 0x1f4   : > { %p723_p9 = pnand %p722_p5, %p716_p6 }
 0x1f6   : > { %726 = shalt.err (!%p723_p9)
}
 0x1f7   : > { %s801_s10 = smov 128  }
 0x1f8   : > { %534 = dma.vmem_to_hbm [thread:$0]  (%p1132_p0), %s1054_s6, 512, %s1052_s19, %s372_s0, %s801_s10, %s801_s10, %s798_s20  }
 0x1f9 PF: > { %s401_s18 = sand.u32 1, %s769_s12   ;;  %p1133_p1 = scmp.ne.s32.totalorder %s1117_s21, 0 }
 0x1fa   : > { %p1134_p2 = scmp.ge.s32.totalorder %s789_s17, 2  ;;  %s402_s27 = scalar_lea.sflag [#allocation4], %s401_s18 }
 0x1fc   : > { %p548_p7 = pnand %p1134_p2, %p1133_p1 }
 0x1fe   : > { %764 = dma.done.wait (!%p548_p7), %s402_s27, 512  }
 0x1ff   : > { %766 = vsyncadd (!%p548_p7), %s402_s27, 4294966784  ;;  %s22_s17 = sadd.s32 1, %s789_s17   ;;  %s1135_s25 = sld [smem:[#allocation13_spill]] }
 0x200   : > { %p19_p4 = scmp.ge.s32.totalorder %s22_s17, 4   ;;  %s1136_s12 = smov %s773_s13 }
 0x201   : > { %s1137_s13 = smov %s777_s14  ;;  %s1138_s14 = smov %s926_s29 }
 0x202   : > { %s1139_s15 = smov %s785_s16  ;;  %21 = sbr.rel (!%p19_p4) target bundleno = 11 (0xb), region = 94 }
 0x205   : > { %s1140_s16 = smov %s1135_s25 }
 0x209   :  { %407 = vsyncpa [#allocation3], 1 }
 0x20a   :  { %409 = vsyncpa [#allocation3 + $0x1], 1 }
 0x20b   :  { %410 = vsyncpa [#allocation6], 1 }
 0x20c   :  { %412 = vsyncpa [#allocation6 + $0x1], 1 }
 0x20d   :  { %413 = vsyncpa [#allocation4], 1 }
 0x20e   :  { %415 = vsyncpa [#allocation4 + $0x1], 1 }

</bundles_post_ra>
